<compile_context>
chip_gen: v7x
topology: tpu7x:2x2x1
jax: 0.10.0
libtpu: 0.0.40
codegen_flags: <defaults>
</compile_context>

<pallas_src>
import functools

import jax
import jax.numpy as jnp
from jax.experimental import pallas as pl
from jax.experimental.pallas import tpu as pltpu


def _ffmv2_kernel(x1_ref, x2_hbm, w_ref, shift_ref, out_ref, sem, *, cf, tp, tail):
    # x1_ref:    (1, Cin, tp)   VMEM activation tile, spatial on lanes
    # x2_hbm:    (N, C2, HW)    raw HBM ref (memory_space=pl.ANY)
    # w_ref:     (Cf, Cin)      conv weight with BN scale folded in
    # shift_ref: (Cf, 1) f32    folded BN shift = beta - mean * scale
    # out_ref:   (1, Cf+C2, tp) concatenated output tile (VMEM)
    # sem:       scalar DMA semaphore scratch
    b = pl.program_id(0)
    j = pl.program_id(1)
    c2 = out_ref.shape[1] - cf

    start = j * tp
    if tp % 128 == 0:
        start = pl.multiple_of(start, 128)

    def x2_copy(size):
        return pltpu.make_async_copy(
            x2_hbm.at[b, :, pl.ds(start, size)],
            out_ref.at[0, pl.ds(cf, c2), pl.ds(0, size)],
            sem)

    def drive(do_start):
        # Start (or wait on) the HBM->output-tile DMA.  The last spatial tile
        # may be ragged; its copy uses the statically-known tail length so the
        # DMA never reads out of bounds.
        def go(size):
            cp = x2_copy(size)
            if do_start:
                cp.start()
            else:
                cp.wait()

        if tail == 0:
            go(tp)
        else:
            last = pl.num_programs(1) - 1

            @pl.when(j < last)
            def _():
                go(tp)

            @pl.when(j == last)
            def _():
                go(tail)

    # Kick off the pass-through copy so the DMA engine fills the concat rows
    # while the MXU does the 1x1 conv.
    drive(True)

    # 1x1 conv == per-pixel matmul over channels; accumulate in f32.
    y = jnp.dot(w_ref[...], x1_ref[0], preferred_element_type=jnp.float32)
    y = jnp.maximum(y + shift_ref[...], 0.0)          # folded BN shift + ReLU
    out_ref[0, :cf, :] = y.astype(out_ref.dtype)

    drive(False)                                       # x2 rows are in place


def _vmem_capacity_bytes():
    """Per-core VMEM capacity; conservative 64 MiB fallback (v7x)."""
    try:
        info = pltpu.get_tpu_info()
        cap = getattr(info, "vmem_capacity_bytes", None)
        if cap:
            return int(cap)
    except Exception:
        pass
    return 64 << 20


def _round_down_128(x):
    return (x // 128) * 128


def _pick_tp(hw, n, c_in, c_out_total, cf, b_x1, b_out, budget_bytes, max_tp=8192):
    """Lane-tile size: as big as the VMEM budget allows, but never so big that
    the grid collapses to a single step (keep ~8 steps for core parallelism)."""
    # Double-buffered x1 input + output tile, plus the f32 matmul intermediate.
    per_lane = 2 * (c_in * b_x1 + c_out_total * b_out) + 2 * cf * 4
    tp_budget = budget_bytes // max(per_lane, 1)
    tp_budget = max(128, _round_down_128(min(tp_budget, max_tp)))

    if hw <= 128:
        return hw  # last-dim block == full dim is always legal

    want_spatial = max(1, -(-8 // max(n, 1)))          # ~8 total grid steps
    tp_parallel = max(128, _round_down_128(-(-hw // want_spatial)))

    tp = max(128, min(tp_budget, tp_parallel))
    if tp >= hw:
        return hw
    return tp


def ffmv2_forward(x1_nchw, x2_nchw, weight, bn_gamma, bn_beta, bn_mean, bn_var,
                  eps=1e-5, tp=None):
    """x1_nchw: (N, Cin, H, W), x2_nchw: (N, C2, H, W). Returns NCHW output.
    Feed bf16 activations/weights for best (bandwidth-bound) performance."""
    n, c_in, h, w_dim = x1_nchw.shape
    n2, c2, h2, w2 = x2_nchw.shape
    assert (n2, h2, w2) == (n, h, w_dim), "x1/x2 batch/spatial mismatch"

    # Accept PyTorch Conv2d weight (Cf, Cin, 1, 1) or squeezed (Cf, Cin).
    w2d = weight.reshape(weight.shape[0], c_in)
    cf = w2d.shape[0]
    hw = h * w_dim
    out_dtype = x1_nchw.dtype

    # Fold BatchNorm (inference): scale into the weight, shift post-matmul.
    scale = bn_gamma.astype(jnp.float32) / jnp.sqrt(bn_var.astype(jnp.float32) + eps)
    w_folded = (w2d.astype(jnp.float32) * scale[:, None]).astype(w2d.dtype)
    shift = (bn_beta.astype(jnp.float32)
             - bn_mean.astype(jnp.float32) * scale).reshape(cf, 1)

    # NCHW -> (N, C, H*W): contiguous reshape, no transpose / extra HBM traffic.
    x1r = x1_nchw.reshape(n, c_in, hw)
    x2r = x2_nchw.reshape(n, c2, hw)

    b_x1 = x1r.dtype.itemsize
    b_out = jnp.dtype(out_dtype).itemsize
    b_w = w_folded.dtype.itemsize

    capacity = _vmem_capacity_bytes()
    budget = min(capacity * 3 // 8, 56 << 20)          # ~24 MiB v7x, ~48 MiB v5e/v6e
    if tp is None:
        tp = _pick_tp(hw, n, c_in, cf + c2, cf, b_x1, b_out, budget)
    tail = 0 if tp >= hw else hw % tp

    # Scoped-VMEM request: pipelined tiles + f32 intermediates + weights.
    vmem_needed = (2 * tp * (c_in * b_x1 + (cf + c2) * b_out)
                   + 2 * tp * cf * 4
                   + 2 * (cf * c_in * b_w + cf * 4))
    vmem_limit = int(min(max(vmem_needed + (8 << 20), 32 << 20), capacity * 3 // 4))

    kernel = functools.partial(_ffmv2_kernel, cf=cf, tp=tp, tail=tail)
    grid = (n, pl.cdiv(hw, tp))

    out = pl.pallas_call(
        kernel,
        out_shape=jax.ShapeDtypeStruct((n, cf + c2, hw), out_dtype),
        grid_spec=pltpu.PrefetchScalarGridSpec(
            num_scalar_prefetch=0,
            grid=grid,
            in_specs=[
                pl.BlockSpec((1, c_in, tp), lambda b, j: (b, 0, j)),
                pl.BlockSpec(memory_space=pl.ANY),      # x2 stays in HBM
                pl.BlockSpec((cf, c_in), lambda b, j: (0, 0)),
                pl.BlockSpec((cf, 1), lambda b, j: (0, 0)),
            ],
            out_specs=pl.BlockSpec((1, cf + c2, tp), lambda b, j: (b, 0, j)),
            scratch_shapes=[pltpu.SemaphoreType.DMA(())],
        ),
        compiler_params=pltpu.CompilerParams(
            dimension_semantics=("parallel", "parallel"),
            vmem_limit_bytes=vmem_limit,
        ),
    )(x1r, x2r, w_folded, shift)

    return out.reshape(n, cf + c2, h, w_dim)


def _reference(x1, x2, weight, gamma, beta, mean, var, eps=1e-5):
    # Pure-JAX f32 reference of the same math (1x1 conv + BN + ReLU + concat).
    w2d = weight.reshape(weight.shape[0], x1.shape[1]).astype(jnp.float32)
    y = jnp.einsum("nchw,fc->nfhw", x1.astype(jnp.float32), w2d)
    s = (gamma / jnp.sqrt(var + eps)).reshape(1, -1, 1, 1)
    b = (beta - mean * (gamma / jnp.sqrt(var + eps))).reshape(1, -1, 1, 1)
    y = jnp.maximum(y * s + b, 0.0)
    return jnp.concatenate([y, x2.astype(jnp.float32)], axis=1)


if __name__ == "__main__":
    key = jax.random.PRNGKey(0)
    k1, k2, k3, k4, k5 = jax.random.split(key, 5)

    # ---------------- f32 check (hw=256, tp=128 -> grid (2, 2), no tail) -----
    N, C_IN, C_F, C2, H, W = 2, 8, 8, 8, 16, 16
    x1 = jax.random.normal(k1, (N, C_IN, H, W), dtype=jnp.float32)
    x2 = jax.random.normal(k2, (N, C2, H, W), dtype=jnp.float32)
    weight = jax.random.normal(k3, (C_F, C_IN), dtype=jnp.float32) * 0.1
    gamma = 1.0 + 0.1 * jax.random.normal(k4, (C_F,), dtype=jnp.float32)
    beta = 0.05 * jax.random.normal(k5, (C_F,), dtype=jnp.float32)
    mean = 0.01 * jnp.ones((C_F,), jnp.float32)
    var = 0.9 * jnp.ones((C_F,), jnp.float32)

    out = jax.block_until_ready(
        ffmv2_forward(x1, x2, weight, gamma, beta, mean, var))
    ref = _reference(x1, x2, weight, gamma, beta, mean, var)
    assert out.shape == (N, C_F + C2, H, W), out.shape
    assert jnp.allclose(out.astype(jnp.float32), ref, atol=1e-4, rtol=1e-4), \
        "f32 mismatch vs reference"

    # -------- bf16 check (hw=144 -> ragged tail, bf16 I/O, split at 16) ------
    Nb, Cb_in, Cb_f, Cb_2, Hb, Wb = 2, 16, 16, 16, 12, 12
    kb1, kb2, kb3 = jax.random.split(k1, 3)
    x1b = jax.random.normal(kb1, (Nb, Cb_in, Hb, Wb), jnp.float32).astype(jnp.bfloat16)
    x2b = jax.random.normal(kb2, (Nb, Cb_2, Hb, Wb), jnp.float32).astype(jnp.bfloat16)
    wb = (jax.random.normal(kb3, (Cb_f, Cb_in), jnp.float32) * 0.1).astype(jnp.bfloat16)
    gb = jnp.ones((Cb_f,), jnp.float32)
    bb = jnp.zeros((Cb_f,), jnp.float32)
    mb = jnp.zeros((Cb_f,), jnp.float32)
    vb = jnp.ones((Cb_f,), jnp.float32)

    outb = jax.block_until_ready(ffmv2_forward(x1b, x2b, wb, gb, bb, mb, vb))
    refb = _reference(x1b.astype(jnp.float32), x2b.astype(jnp.float32),
                      wb.astype(jnp.float32), gb, bb, mb, vb)
    assert outb.shape == (Nb, Cb_f + Cb_2, Hb, Wb), outb.shape
    assert jnp.allclose(outb.astype(jnp.float32), refb, atol=5e-2, rtol=5e-2), \
        "bf16 mismatch vs reference"

    print("KERNEL_OK")
</pallas_src>

<mosaic_0001>
module attributes {stable_mosaic.version = 11 : i64} {
  func.func @_ffmv2_kernel(%arg0: i32, %arg1: i32, %arg2: memref<1x8x128xf32, #tpu.memory_space<vmem>>, %arg3: memref<2x8x256xf32, #tpu.memory_space<any>>, %arg4: memref<8x8xf32, #tpu.memory_space<vmem>>, %arg5: memref<8x1xf32, #tpu.memory_space<vmem>>, %arg6: memref<1x16x128xf32, #tpu.memory_space<vmem>>, %arg7: memref<!tpu.dma_semaphore, #tpu.memory_space<semaphore_mem>>) attributes {dimension_semantics = [#tpu.dimension_semantics<parallel>, #tpu.dimension_semantics<parallel>], iteration_bounds = array<i64: 2, 2>, scalar_prefetch = 0 : i64, scratch_operands = 1 : i64, tpu.core_type = #tpu.core_type<tc>, window_params = [{transform_indices = @transform_0, window_bounds = array<i64: 1, 8, 128>}, {}, {pipeline_mode = #tpu.pipeline_mode<synchronous>, transform_indices = @transform_2, window_bounds = array<i64: 8, 8>}, {pipeline_mode = #tpu.pipeline_mode<synchronous>, transform_indices = @transform_3, window_bounds = array<i64: 8, 1>}, {transform_indices = @transform_4, window_bounds = array<i64: 1, 16, 128>}]} {
    %c128_i32 = arith.constant 128 : i32
    %0 = arith.muli %arg1, %c128_i32 : i32
    %1 = tpu.assume_multiple %0, 128 : i32
    %c0_i32 = arith.constant 0 : i32
    %c0_i32_0 = arith.constant 0 : i32
    %2 = tpu.memref_slice %arg3[%arg0, %c0_i32_0, %1] : memref<2x8x256xf32, #tpu.memory_space<any>> -> memref<1x8x128xf32, #tpu.memory_space<any>>
    %3 = tpu.memref_squeeze %2 : memref<1x8x128xf32, #tpu.memory_space<any>> -> memref<8x128xf32, #tpu.memory_space<any>>
    %c8_i32 = arith.constant 8 : i32
    %c0_i32_1 = arith.constant 0 : i32
    %4 = tpu.memref_slice %arg6[%c0_i32, %c8_i32, %c0_i32_1] : memref<1x16x128xf32, #tpu.memory_space<vmem>> -> memref<1x8x128xf32, #tpu.memory_space<vmem>>
    %5 = tpu.memref_squeeze %4 : memref<1x8x128xf32, #tpu.memory_space<vmem>> -> memref<8x128xf32, #tpu.memory_space<vmem>>
    tpu.enqueue_dma source(%3 : memref<8x128xf32, #tpu.memory_space<any>>) target(%5 : memref<8x128xf32, #tpu.memory_space<vmem>>) target_semaphore(%arg7 : memref<!tpu.dma_semaphore, #tpu.memory_space<semaphore_mem>>)
    %c0 = arith.constant 0 : index
    %c0_2 = arith.constant 0 : index
    %6 = vector.load %arg4[%c0, %c0_2] : memref<8x8xf32, #tpu.memory_space<vmem>>, vector<8x8xf32>
    %c0_3 = arith.constant 0 : index
    %c0_4 = arith.constant 0 : index
    %c0_5 = arith.constant 0 : index
    %7 = vector.load %arg2[%c0_3, %c0_4, %c0_5] : memref<1x8x128xf32, #tpu.memory_space<vmem>>, vector<1x8x128xf32>
    %8 = vector.shape_cast %7 : vector<1x8x128xf32> to vector<8x128xf32>
    %cst = arith.constant dense<0.000000e+00> : vector<8x128xf32>
    %9 = tpu.matmul %6, %8, %cst {dimension_numbers = #tpu.dot_dimension_numbers<[1], [0], [0], [1], [0, 0, 1, 1], [], []>} : vector<8x8xf32>, vector<8x128xf32>, vector<8x128xf32> -> vector<8x128xf32>
    %c0_6 = arith.constant 0 : index
    %c0_7 = arith.constant 0 : index
    %10 = vector.load %arg5[%c0_6, %c0_7] : memref<8x1xf32, #tpu.memory_space<vmem>>, vector<8x1xf32>
    %11 = vector.broadcast %10 : vector<8x1xf32> to vector<8x128xf32>
    %12 = arith.addf %9, %11 : vector<8x128xf32>
    %cst_8 = arith.constant 0.000000e+00 : f32
    %13 = vector.broadcast %cst_8 : f32 to vector<8x128xf32>
    %14 = arith.maximumf %12, %13 : vector<8x128xf32>
    %c0_9 = arith.constant 0 : index
    %c0_10 = arith.constant 0 : index
    %c0_11 = arith.constant 0 : index
    %15 = vector.load %arg6[%c0_9, %c0_10, %c0_11] : memref<1x16x128xf32, #tpu.memory_space<vmem>>, vector<1x8x128xf32>
    %16 = vector.shape_cast %15 : vector<1x8x128xf32> to vector<8x128xf32>
    %17 = vector.shape_cast %14 : vector<8x128xf32> to vector<1x8x128xf32>
    tpu.vector_store %arg6[%c0_9, %c0_10, %c0_11], %17 {strides = array<i32>} : memref<1x16x128xf32, #tpu.memory_space<vmem>>, vector<1x8x128xf32>,
    %c0_i32_12 = arith.constant 0 : i32
    %c0_i32_13 = arith.constant 0 : i32
    %18 = tpu.memref_slice %arg3[%arg0, %c0_i32_13, %1] : memref<2x8x256xf32, #tpu.memory_space<any>> -> memref<1x8x128xf32, #tpu.memory_space<any>>
    %19 = tpu.memref_squeeze %18 : memref<1x8x128xf32, #tpu.memory_space<any>> -> memref<8x128xf32, #tpu.memory_space<any>>
    %c8_i32_14 = arith.constant 8 : i32
    %c0_i32_15 = arith.constant 0 : i32
    %20 = tpu.memref_slice %arg6[%c0_i32_12, %c8_i32_14, %c0_i32_15] : memref<1x16x128xf32, #tpu.memory_space<vmem>> -> memref<1x8x128xf32, #tpu.memory_space<vmem>>
    %21 = tpu.memref_squeeze %20 : memref<1x8x128xf32, #tpu.memory_space<vmem>> -> memref<8x128xf32, #tpu.memory_space<vmem>>
    tpu.wait_dma2 semaphore(%arg7 : memref<!tpu.dma_semaphore, #tpu.memory_space<semaphore_mem>>) src(%19 : memref<8x128xf32, #tpu.memory_space<any>>) dst(%21 : memref<8x128xf32, #tpu.memory_space<vmem>>)
    return
  }
  func.func @transform_0(%arg0: i32, %arg1: i32) -> (i32, i32, i32) {
    %c0_i32 = arith.constant 0 : i32
    %c0_i32_0 = arith.constant 0 : i32
    return %arg0, %c0_i32, %arg1 : i32, i32, i32
  }
  func.func @transform_2(%arg0: i32, %arg1: i32) -> (i32, i32) {
    %c0_i32 = arith.constant 0 : i32
    %c0_i32_0 = arith.constant 0 : i32
    %c0_i32_1 = arith.constant 0 : i32
    return %c0_i32, %c0_i32_0 : i32, i32
  }
  func.func @transform_3(%arg0: i32, %arg1: i32) -> (i32, i32) {
    %c0_i32 = arith.constant 0 : i32
    %c0_i32_0 = arith.constant 0 : i32
    %c0_i32_1 = arith.constant 0 : i32
    return %c0_i32, %c0_i32_0 : i32, i32
  }
  func.func @transform_4(%arg0: i32, %arg1: i32) -> (i32, i32, i32) {
    %c0_i32 = arith.constant 0 : i32
    %c0_i32_0 = arith.constant 0 : i32
    return %arg0, %c0_i32, %arg1 : i32, i32, i32
  }
}

</mosaic_0001>

<bundles_post_ra>
// kernel: tpu_custom_call.1
= control target key start
LH: loop header
LB: loop body
LE: loop exit
PB: predicated region body
PF: predicated region fallthrough
CT: control target
= control target key end

     0   :  { %s950_s0 = inlined_call_operand.hbm [shape: f32[2,8,256], index: 0, kind: input, shape index: {}]   ;;  %s951_s1 = inlined_call_operand.hbm [shape: f32[2,8,256], index: 1, kind: input, shape index: {}]   ;;  %s952_s2 = inlined_call_operand.vmem [shape: f32[8,8], index: 2, kind: input, shape index: {}]   ;;  %s953_s3 = inlined_call_operand.vmem [shape: f32[8,1], index: 3, kind: input, shape index: {}]   ;;  %s954_s4 = inlined_call_operand.hbm [shape: f32[2,16,256], index: 4, kind: output, shape index: {}]  }
   0x1   :  { %958 = sst [smem:[#allocation16_spill]] %s950_s0 }
   0x2   :  { %959 = sst [smem:[#allocation17_spill]] %s952_s2 }
   0x3   :  { %960 = sst [smem:[#allocation18_spill]] %s953_s3 }
   0x4   :  { %9 = vsyncpa [#allocation4], 0 }
   0x5   :  { %11 = vsyncpa [#allocation4 + $0x1], 0 }
   0x6   :  { %12 = vsyncpa [#allocation5], 0 }
   0x7   :  { %14 = vsyncpa [#allocation5 + $0x1], 0  ;;  %s726_s15 = smov 0   ;;  %s728_s16 = smov 0  }
   0x8   :  { %s730_s17 = smov 0   ;;  %s732_s18 = smov 0  }
   0x9   :  { %s734_s19 = smov 0   ;;  %s736_s20 = smov 0  }
   0xa   :  { %s738_s21 = smov 0   ;;  %s740_s22 = smov 0  }
   0xb LB: > { %s425_s23 = sadd.s32 4294967295, %s691_s22   ;;  %s426_s24 = sadd.s32 4294967294, %s691_s22   ;;  %s691_s22 = sphi %s740_s22, %s20_s22   ;;  %s687_s21 = sphi %s738_s21, %s983_s21   ;;  %s683_s20 = sphi %s736_s20, %s982_s20   ;;  %s679_s19 = sphi %s734_s19, %s981_s19   ;;  %s675_s18 = sphi %s732_s18, %s980_s18   ;;  %s671_s17 = sphi %s730_s17, %s979_s17   ;;  %s667_s16 = sphi %s728_s16, %s978_s16   ;;  %s663_s15 = sphi %s726_s15, %s977_s15  }
   0xc   : > { %s29_s25 = sadd.s32 1, %s683_s20  ;;  %s32_s26 = sadd.s32 1, %s687_s21 }
   0xd   : > { %p30_p0 = scmp.ge.s32.totalorder %s29_s25, 2  ;;  %s41_s27 = sadd.s32 1, %s671_s17 }
   0xe   : > { %p48_p1 = scmp.ne.s32.totalorder %s671_s17, %s667_s16  ;;  %p49_p2 = scmp.eq.s32.totalorder %s691_s22, 0 }
   0xf   : > { %s985_s25 = smov (%p30_p0, %s29_s25), 0  ;;  %s987_s26 = smov (!%p30_p0, %s32_s26), %s687_s21 }
  0x10   : > { %961 = sst [smem:[#allocation14_spill]] %s985_s25  ;;  %s37_s28 = ssub.s32 %s683_s20, %s985_s25 }
  0x11   : > { %p779_p3 = por %p49_p2, %p48_p1  ;;  %p34_p4 = scmp.ge.s32.totalorder %s987_s26, 2 }
  0x12   : > { %p54_p5 = scmp.ne.s32.totalorder %s667_s16, %s663_s15  ;;  %p55_p6 = scmp.eq.s32.totalorder %s425_s23, 0 }
  0x13   : > { %p122_p7 = scmp.eq.s32.totalorder %s425_s23, 3  ;;  %s989_s26 = smov (%p34_p4, %s987_s26), 0 }
  0x14   : > { %963 = sst [smem:[#allocation15_spill]] %s989_s26  ;;  %p787_p8 = por %p55_p6, %p54_p5 }
  0x15   : > { %p791_p9 = por %p122_p7, %p48_p1  ;;  %s36_s6 = ssub.s32 %s687_s21, %s989_s26 }
  0x16   : > { %p128_p10 = scmp.eq.s32.totalorder %s426_s24, 3  ;;  %s38_s7 = sor.u32 %s37_s28, %s36_s6 }
  0x17   : > { %s965_s5 = scalar_select %p791_p9, 1, 0 }
  0x18   : > { %p39_p11 = scmp.eq.s32.totalorder %s38_s7, 0  ;;  %p797_p12 = por %p128_p10, %p54_p5 }
  0x19   : > { %p464_p13 = scmp.lt.s32.totalorder %s691_s22, 4  ;;  %s154_s9 = sand.u32 1, %s671_s17  }
  0x1a   : > { %s966_s8 = scalar_select %p797_p12, 1, 0 }
  0x1b   : > { %s804_s10 = scalar_select %p39_p11, %s671_s17, %s41_s27  }
  0x1c   : > { %s429_s11 = sshll.u32 %s154_s9, 3  ;;  %s430_s12 = sshll.u32 %s687_s21, 1 }
  0x1d   : > { %s163_s13 = sadd.s32 %s683_s20, %s430_s12  ;;  %s158_s14 = scalar_lea.vmem [#allocation3], %s429_s11 }
  0x1e   : > { %s167_s23 = sshll.u32 %s158_s14, 4  ;;  %s431_s26 = sshll.u32 %s163_s13, 7  ;;  %s808_s23 = int_to_ptr.vmem [resolvable:$true] %s167_s23 }
  0x1f   : > { %s967_s0 = sld [smem:[#allocation16_spill]]  ;;  %p817_p0 = pnand %p464_p13, %p779_p3 }
  0x20   : > { %s155_s7 = scalar_lea.sflag [#allocation4], %s154_s9 }
  0x21   : > { %p539_p5 = pneg %p817_p0 }
  0x25   : > { %s813_s6 = scalar_lea.hbm %s967_s0, %s431_s26  ;;  %s542_s12 = scalar_lea.hbm %s967_s0, 512 }
  0x26   : > { %s537_s11 = scalar_lea.hbm %s813_s6, 128  ;;  %p543_p3 = scmp.lt.u32.totalorder %s813_s6, %s967_s0 }
  0x27   : > { %p538_p4 = scmp.ne.s32.totalorder %s813_s6, %s537_s11  ;;  %p544_p10 = scmp.lt.u32.totalorder %s542_s12, %s537_s11 }
  0x28   : > { %p546_p13 = scmp.lt.u32.totalorder %s537_s11, %s813_s6 }
  0x29   : > { %p540_p6 = pnand %p539_p5, %p538_p4  ;;  %p545_p11 = por %p544_p10, %p543_p3 }
  0x2b   : > { %p541_p7 = pneg %p540_p6  ;;  %p547_p1 = por %p546_p13, %p545_p11 }
  0x2d   : > { %p548_p2 = pnand %p547_p1, %p541_p7 }
  0x2f   : > { %551 = shalt.err (!%p548_p2)
}
  0x30   : > { %s552_s9 = scalar_lea.vmem %s808_s23, 128  ;;  %s693_s24 = smov [#allocation3]  }
  0x31   : > { %p553_p4 = scmp.ne.s32.totalorder %s808_s23, %s552_s9  ;;  %s557_s28 = sshll.u32 %s693_s24, 4  ;;  %s558_s28 = int_to_ptr.vmem [resolvable:$false] %s557_s28 }
  0x32   : > { %s559_s26 = scalar_lea.vmem %s558_s28, 256  ;;  %p560_p9 = scmp.lt.s32.totalorder %s808_s23, %s558_s28 }
  0x33   : > { %p555_p6 = pnand %p553_p4, %p539_p5  ;;  %p561_p3 = scmp.lt.s32.totalorder %s559_s26, %s552_s9 }
  0x35   : > { %p556_p12 = pneg %p555_p6  ;;  %p562_p10 = por %p561_p3, %p560_p9 }
  0x37   : > { %p563_p11 = pnand %p562_p10, %p556_p12 }
  0x39   : > { %566 = shalt.err (!%p563_p11)
}
  0x3a   : > { %459 = dma.hbm_to_vmem [thread:$0]  (!%p817_p0), %s813_s6, 128, %s808_s23, %s155_s7  }
  0x3b   : > { %p969_p1 = scmp.lt.s32.totalorder %s691_s22, 5  ;;  %p970_p2 = scmp.ge.s32.totalorder %s691_s22, 1 }
  0x3d   : > { %p173_p5 = pnand %p970_p2, %p969_p1 }
  0x3e   : > { %s853_s11 = sand.u32 (!%p173_p5), 1, %s667_s16  }
  0x3f   : > { %176 = sbr.rel (%p173_p5) target bundleno = 324 (0x144), region = 32  ;;  %s433_s29 = sshll.u32 (!%p173_p5), %s853_s11, 3 }
  0x40   : > { %s179_s12 = scalar_lea.sflag (!%p173_p5), [#allocation4], %s853_s11  ;;  %s182_s13 = scalar_lea.vmem (!%p173_p5), [#allocation3], %s433_s29 }
  0x46   : > { %652 = dma.done.wait (%p787_p8), %s179_s12, 128  }
  0x47   : > { %654 = vsyncadd (%p787_p8), %s179_s12, 4294967168  ;;  %v694_v0 = vmov 0.0   ;;  %vm695_vm0 = vmmov 0   ;;  %v696_v1 = vmov 0   ;;  %vm232_vm1 = vcmask 64512   ;;  %v225_v2 = vld [vmem:[%s182_s13] sm:$0xff] }
  0x48   : > { %447 = vmatprep.subr.mxu0 %v694_v0  ;;  %449 = vmatprep.mubr.msk.f32.mxu0 %vm695_vm0, %v694_v0  ;;  %s971_s2 = sld [smem:[#allocation17_spill]]  ;;  %s972_s3 = sld [smem:[#allocation18_spill]] }
  0x49   : > { %536 = vset.pattern.permute.xlu0 %v696_v1  ;;  %448 = vmatpush3.msra.mxu0 %v225_v2  ;;  %s434_s30 = sshll.u32 %s853_s11, 4  ;;  %s435_s14 = sshll.u32 %s675_s18, 7 }
  0x4a   : > { %s206_s9 = sshra.s32 %s435_s14, 7  ;;  %s436_s24 = sshll.u32 %s679_s19, 1 }
  0x4b   : > { %s870_s28 = scalar_lea.vmem [#allocation6], %s434_s30  ;;  %s209_s29 = sadd.s32 %s436_s24, %s206_s9 }
  0x4c   : > { %s212_s26 = scalar_lea.vmem %s870_s28, 8 [#allocation6]  ;;  %s437_s13 = sshll.u32 %s209_s29, 7 }
  0x4d   : > { %s220_s12 = sshll.u32 %s212_s26, 4  ;;  %s211_s27 = scalar_lea.hbm %s951_s1, %s437_s13  ;;  %s221_s12 = int_to_ptr.vmem [resolvable:$true] %s220_s12 }
  0x4e   : > { %v224_v3 = vld [vmem:[%s971_s2] sm:$0xff]  ;;  %s567_s7 = scalar_lea.hbm %s211_s27, 128  ;;  %p570_p9 = scmp.lt.u32.totalorder %s211_s27, %s951_s1 }
  0x4f   : > { %v226_v4 = vld [vmem:[%s972_s3] sm:$0xff]  ;;  %450 = vmatmul.mubr.msk.f32.vlgmr.msra.gmra.mrb[0].mxu0 %vm232_vm1, %v224_v3  ;;  %p568_p8 = scmp.ne.s32.totalorder %s211_s27, %s567_s7  ;;  %s569_s3 = scalar_lea.hbm %s951_s1, 512 }
  0x50   : > { %229 = vperm.xlu0 %536, %v226_v4   ;;  %p571_p12 = scmp.lt.u32.totalorder %s569_s3, %s567_s7  ;;  %p573_p7 = scmp.lt.u32.totalorder %s567_s7, %s211_s27 }
  0x52   : > { %p572_p0 = por %p571_p12, %p570_p9 }
  0x54   : > { %p574_p13 = por %p573_p7, %p572_p0 }
  0x56   : > { %p575_p4 = pnand %p574_p13, %p568_p8 }
  0x58   : > { %578 = shalt.err (!%p575_p4)  }
  0x59   : > { %s579_s30 = scalar_lea.vmem %s221_s12, 128  ;;  %s697_s9 = smov [#allocation6]  }
  0x5a   : > { %p580_p6 = scmp.ne.s32.totalorder %s221_s12, %s579_s30  ;;  %s581_s24 = sshll.u32 %s697_s9, 4  ;;  %s882_s24 = int_to_ptr.vmem [resolvable:$false] %s581_s24 }
  0x5b   : > { %s583_s0 = scalar_lea.vmem %s882_s24, 512  ;;  %p584_p3 = scmp.lt.s32.totalorder %s221_s12, %s882_s24 }
  0x5c   : > { %p585_p10 = scmp.lt.s32.totalorder %s583_s0, %s579_s30 }
  0x5e   : > { %p586_p11 = por %p585_p10, %p584_p3 }
  0x60   : > { %p587_p1 = pnand %p586_p11, %p580_p6 }
  0x62   : > { %590 = shalt.err (!%p587_p1)  }
  0x63   : > { %223 = dma.hbm_to_vmem [thread:$0]  %s211_s27, 128, %s221_s12, [#allocation2] }
  0xcf   : > { %v230_v5 = vpop.permute.xlu0 %229 }
 0x122   : > { %v302_v6 = vpop.f32.mrb[0].mxu0 }
 0x123   : > { %v303_v7 = vadd.f32 %v302_v6, %v230_v5  ;;  %v451_v8 = vpop.f32.mrb[1].mxu0 }
 0x125   : > { %v306_v9 = vmax.f32 %v303_v7, 0.0 }
 0x127   : > { %307 = vst [vmem:[%s870_s28] sm:$0xff] %v306_v9 }
 0x128   : > { %655 = dma.done.wait [#allocation2], 128 }
 0x129   : > { %656 = vsyncadd [#allocation2], 4294967168  ;;  %s440_s2 = sshll.u32 %s679_s19, 2  ;;  %s327_s25 = sshll.u32 %s870_s28, 4  ;;  %s890_s25 = int_to_ptr.vmem [resolvable:$true] %s327_s25 }
 0x12a   : > { %s324_s3 = sadd.s32 %s675_s18, %s440_s2  ;;  %s313_s23 = scalar_lea.sflag [#allocation5], %s853_s11 }
 0x12b   : > { %s441_s26 = sshll.u32 %s324_s3, 7  ;;  %s591_s6 = scalar_lea.vmem %s890_s25, 256 }
 0x12c   : > { %s895_s13 = scalar_lea.hbm %s954_s4, %s441_s26  ;;  %p592_p2 = scmp.ne.s32.totalorder %s890_s25, %s591_s6 }
 0x12d   : > { %p973_p5 = scmp.ne.s32.totalorder %s965_s5, 0  ;;  %p598_p12 = scmp.lt.s32.totalorder %s890_s25, %s882_s24 }
 0x12e   : > { %p599_p0 = scmp.lt.s32.totalorder %s583_s0, %s591_s6 }
 0x12f   : > { %p593_p8 = pnand %p592_p2, %p973_p5 }
 0x130   : > { %p600_p7 = por %p599_p0, %p598_p12 }
 0x131   : > { %p594_p9 = pneg %p593_p8 }
 0x133   : > { %p601_p13 = pnand %p600_p7, %p594_p9 }
 0x135   : > { %604 = shalt.err (!%p601_p13)
}
 0x136   : > { %s605_s18 = scalar_lea.hbm %s895_s13, 256  ;;  %s609_s27 = scalar_lea.hbm %s954_s4, 1024 }
 0x137   : > { %p606_p4 = scmp.ne.s32.totalorder %s895_s13, %s605_s18  ;;  %p610_p10 = scmp.lt.u32.totalorder %s895_s13, %s954_s4 }
 0x138   : > { %p611_p11 = scmp.lt.u32.totalorder %s609_s27, %s605_s18  ;;  %p613_p2 = scmp.lt.u32.totalorder %s605_s18, %s895_s13 }
 0x139   : > { %p607_p6 = pnand %p606_p4, %p973_p5 }
 0x13a   : > { %p612_p1 = por %p611_p11, %p610_p10 }
 0x13b   : > { %p608_p3 = pneg %p607_p6 }
 0x13c   : > { %p614_p8 = por %p613_p2, %p612_p1 }
 0x13e   : > { %p615_p9 = pnand %p614_p8, %p608_p3 }
 0x140   : > { %618 = shalt.err (!%p615_p9)
}
 0x141   : > { %s698_s30 = smov 128   ;;  %s699_s9 = smov 256  }
 0x142   : > { %s700_s24 = smov 8  }
 0x143   : > { %454 = dma.vmem_to_hbm [thread:$0]  (%p973_p5), %s890_s25, 256, %s895_s13, %s313_s23, %s698_s30, %s699_s9, %s700_s24  }
 0x144 PF: > { %p465_p12 = scmp.ge.s32.totalorder %s691_s22, 2  ;;  %s342_s0 = sand.u32 1, %s663_s15  }
 0x145   : > { %p974_p0 = scmp.ne.s32.totalorder %s966_s8, 0  ;;  %s343_s2 = scalar_lea.sflag [#allocation5], %s342_s0 }
 0x147   : > { %p461_p7 = pnand %p465_p12, %p974_p0 }
 0x149   : > { %658 = dma.done.wait (!%p461_p7), %s343_s2, 256  }
 0x14a   : > { %660 = vsyncadd (!%p461_p7), %s343_s2, 4294967040  ;;  %s20_s22 = sadd.s32 1, %s691_s22   ;;  %s975_s5 = sld [smem:[#allocation14_spill]] }
 0x14b   : > { %p17_p13 = scmp.ge.s32.totalorder %s20_s22, 6   ;;  %s976_s11 = sld [smem:[#allocation15_spill]] }
 0x14c   : > { %s977_s15 = smov %s667_s16  ;;  %s978_s16 = smov %s671_s17 }
 0x14d   : > { %s979_s17 = smov %s804_s10  ;;  %s980_s18 = smov %s683_s20 }
 0x14e   : > { %s981_s19 = smov %s687_s21  ;;  %19 = sbr.rel (!%p17_p13) target bundleno = 11 (0xb), region = 83 }
 0x150   : > { %s982_s20 = smov %s975_s5 }
 0x151   : > { %s983_s21 = smov %s976_s11 }
 0x155   :  { %348 = vsyncpa [#allocation4], 1 }
 0x156   :  { %350 = vsyncpa [#allocation4 + $0x1], 1 }
 0x157   :  { %351 = vsyncpa [#allocation5], 1 }
 0x158   :  { %353 = vsyncpa [#allocation5 + $0x1], 1 }
 0x159   :  { %354 = vsyncmov [#allocation2] }
 0x15c   :  { %s355_s8 = vpop.sfrf %354 }
 0x15d   :  { %p444_p5 = scmp.ne.s32.totalorder %s355_s8, 0 }
 0x15f   :  { %359 = shalt.err (%p444_p5)  }

</bundles_post_ra>
